<compile_context>
chip_gen: v5e
topology: v5e:2x2
jax: 0.10.0
libtpu: 0.0.40
codegen_flags: <defaults>
</compile_context>

<pallas_src>
import functools

import jax
import jax.numpy as jnp
from jax.experimental import pallas as pl
from jax.experimental.pallas import tpu as pltpu


def _spatial_transformer_kernel(src_hi_ref, src_lo_ref, df_ref, out_ref, *,
                                C, H, W, T, contract_w):
    """src_hi_ref/src_lo_ref: (C*A, B) bf16 hi/lo split of the source image,
         resident in VMEM across the grid.  B = contraction axis (the larger
         spatial axis), A = reduce axis (the smaller one).
       df_ref : (2, T) f32  displacement-field tile (row disp, col disp).
       out_ref: (C, T) f32  lane-dense output tile.
    """
    t = pl.program_id(0)
    hf = jnp.float32(H)
    wf = jnp.float32(W)

    # Flat output-pixel index of this tile (exact in f32 below 2**24 pixels).
    p = (jax.lax.broadcasted_iota(jnp.int32, (1, T), 1) + t * T).astype(jnp.float32)
    row = jnp.floor(p / wf)          # identity grid, channel 0 (height index)
    col = p - row * wf               # identity grid, channel 1 (width index)

    new_row = row + df_ref[0:1, :]   # (1, T)
    new_col = col + df_ref[1:2, :]   # (1, T)

    # Match the PyTorch chain op-for-op (module's normalize, then
    # grid_sample's align_corners=False un-normalization) so boundary / .5
    # rounding cases agree with the reference semantics.
    gy = 2.0 * (new_row / jnp.float32(H - 1) - 0.5)
    gx = 2.0 * (new_col / jnp.float32(W - 1) - 0.5)
    iy = ((gy + 1.0) * hf - 1.0) * 0.5
    ix = ((gx + 1.0) * wf - 1.0) * 0.5

    # nearest neighbour: round-half-to-even, matching torch's nearbyint
    iyn = jnp.round(iy)
    ixn = jnp.round(ix)

    in_bounds = ((ixn >= 0.0) & (ixn <= wf - 1.0) &
                 (iyn >= 0.0) & (iyn <= hf - 1.0))

    iy_i = jnp.clip(iyn, 0.0, hf - 1.0).astype(jnp.int32)   # (1, T)
    ix_i = jnp.clip(ixn, 0.0, wf - 1.0).astype(jnp.int32)   # (1, T)

    # MXU contracts over the larger spatial axis (B); the VPU masked-reduce
    # runs over the smaller one (A).  padding_mode='zeros' is folded into the
    # contraction index: -1 matches no one-hot row, so OOB pixels gather 0.
    if contract_w:
        A, B = H, W
        csel = jnp.where(in_bounds, ix_i, -1)    # contraction index (width)
        rsel = iy_i                              # reduce index (height)
    else:
        A, B = W, H
        csel = jnp.where(in_bounds, iy_i, -1)    # contraction index (height)
        rsel = ix_i                              # reduce index (width)

    # One-hot selector in bf16 (0/1 exact) -> single-pass MXU matmuls, and
    # half the VMEM traffic of an f32 selector.
    colsel = (jax.lax.broadcasted_iota(jnp.int32, (B, T), 0) == csel
              ).astype(jnp.bfloat16)                                   # (B, T)

    # Gather along the contraction axis for all channels:
    #   (C*A, B) @ (B, T) -> (C*A, T), f32 accumulation.
    # Each dot has exactly one 1.0 * value term; hi + lo recovers ~f32 values.
    colg = jnp.dot(src_hi_ref[...], colsel,
                   preferred_element_type=jnp.float32,
                   precision=jax.lax.Precision.DEFAULT)
    colg = colg + jnp.dot(src_lo_ref[...], colsel,
                          preferred_element_type=jnp.float32,
                          precision=jax.lax.Precision.DEFAULT)

    # Row selection as a boolean mask fused into the reduce over A (no
    # materialized f32 selector, no extra multiplies).
    rowmask = jax.lax.broadcasted_iota(jnp.int32, (A, T), 0) == rsel   # (A, T) bool
    for c in range(C):                        # C is tiny and static -> unrolled
        seg = colg[c * A:(c + 1) * A, :]      # (A, T) static slice
        out_ref[c:c + 1, :] = jnp.sum(jnp.where(rowmask, seg, 0.0),
                                      axis=0, keepdims=True)            # (1, T)


def _pick_tile(HW):
    """Largest lane-dense tile (multiple of 128) dividing HW, preferring >=2 grid steps."""
    for t in (2048, 1024, 512, 256, 128):
        if HW % t == 0 and HW // t >= 2:
            return t
    for t in (2048, 1024, 512, 256, 128):
        if HW % t == 0:
            return t
    return HW   # odd sizes: single whole-image block (block == full dims is legal)


def spatial_transformer(src, df):
    """src: (1, C, H, W) f32, df: (1, 2, H, W) f32 -> (1, C, H, W) f32."""
    assert src.ndim == 4 and df.ndim == 4
    B, C, H, W = src.shape
    assert B == 1 and df.shape == (B, 2, H, W)
    # PyTorch divides by (size-1); degenerate 1-pixel axes would produce inf.
    assert H > 1 and W > 1
    HW = H * W
    T = _pick_tile(HW)
    contract_w = W >= H          # MXU contracts the larger spatial axis

    src_f32 = src[0].astype(jnp.float32)
    if contract_w:
        src_mat = src_f32.reshape(C * H, W)                              # (C*H, W)
        A, Bc = H, W
    else:
        src_mat = jnp.transpose(src_f32, (0, 2, 1)).reshape(C * W, H)    # (C*W, H)
        A, Bc = W, H

    # hi/lo bf16 split of the source (computed once at the XLA level; both
    # halves stay resident in VMEM across the grid).
    src_hi = src_mat.astype(jnp.bfloat16)
    src_lo = (src_mat - src_hi.astype(jnp.float32)).astype(jnp.bfloat16)

    df_flat = df[0].astype(jnp.float32).reshape(2, HW)                   # (2, HW)
    # NOTE: for batch > 1 this would add a leading grid axis and a squeezed
    # batch block; the module spec fixes batch = 1.

    kernel = functools.partial(_spatial_transformer_kernel,
                               C=C, H=H, W=W, T=T, contract_w=contract_w)

    cost = pl.CostEstimate(
        flops=4 * C * H * W * HW,                    # two bf16 one-hot matmuls
        transcendentals=0,
        bytes_accessed=int(2 * src_hi.size * 2 + df_flat.size * 4 + C * HW * 4),
    )

    out_flat = pl.pallas_call(
        kernel,
        out_shape=jax.ShapeDtypeStruct((C, HW), jnp.float32),
        grid_spec=pltpu.PrefetchScalarGridSpec(
            num_scalar_prefetch=0,
            grid=(HW // T,),
            in_specs=[
                # whole source image (hi/lo) resident in VMEM across the grid
                pl.BlockSpec((C * A, Bc), lambda t: (0, 0)),
                pl.BlockSpec((C * A, Bc), lambda t: (0, 0)),
                # displacement field streamed per output-pixel tile
                pl.BlockSpec((2, T), lambda t: (0, t)),
            ],
            out_specs=pl.BlockSpec((C, T), lambda t: (0, t)),
        ),
        compiler_params=pltpu.CompilerParams(
            dimension_semantics=("parallel",),       # shard tiles across TCs
            vmem_limit_bytes=48 * 1024 * 1024,       # T=2048 working set on v5e
        ),
        cost_estimate=cost,
    )(src_hi, src_lo, df_flat)

    return out_flat.reshape(C, H, W)[None]           # free reshape at XLA level


def _reference(src, df):
    """Pure-JAX reference of the module semantics (nearest, zeros padding,
    align_corners=False), written with the same un-fused normalize ->
    un-normalize chain as PyTorch / the kernel."""
    _, C, H, W = src.shape
    row = jax.lax.broadcasted_iota(jnp.float32, (H, W), 0)
    col = jax.lax.broadcasted_iota(jnp.float32, (H, W), 1)
    new_row = row + df[0, 0]
    new_col = col + df[0, 1]
    gy = 2.0 * (new_row / jnp.float32(H - 1) - 0.5)
    gx = 2.0 * (new_col / jnp.float32(W - 1) - 0.5)
    iy = ((gy + 1.0) * H - 1.0) / 2.0
    ix = ((gx + 1.0) * W - 1.0) / 2.0
    iyn = jnp.round(iy)
    ixn = jnp.round(ix)
    inb = (ixn >= 0) & (ixn <= W - 1) & (iyn >= 0) & (iyn <= H - 1)
    iyc = jnp.clip(iyn, 0, H - 1).astype(jnp.int32)
    ixc = jnp.clip(ixn, 0, W - 1).astype(jnp.int32)
    gathered = src[0][:, iyc, ixc]                       # (C, H, W)
    return (gathered * inb[None].astype(src.dtype))[None]


if __name__ == "__main__":
    key = jax.random.PRNGKey(0)

    # Case 1: square image (contract over W, reduce over H).
    H, W = 16, 16
    k1, k2, k3, k4 = jax.random.split(key, 4)
    src = jax.random.uniform(k1, (1, 3, H, W), dtype=jnp.float32)
    df = jax.random.uniform(k2, (1, 2, H, W), dtype=jnp.float32,
                            minval=-3.0, maxval=5.0)
    out = jax.block_until_ready(spatial_transformer(src, df))
    ref = _reference(src, df)
    assert out.shape == (1, 3, H, W)
    assert jnp.allclose(out, ref, atol=1e-5), "mismatch vs reference (16x16)"

    # Case 2: tall image (H > W) exercises the transposed contraction path.
    H2, W2 = 24, 16
    src2 = jax.random.uniform(k3, (1, 3, H2, W2), dtype=jnp.float32)
    df2 = jax.random.uniform(k4, (1, 2, H2, W2), dtype=jnp.float32,
                             minval=-4.0, maxval=6.0)
    out2 = jax.block_until_ready(spatial_transformer(src2, df2))
    ref2 = _reference(src2, df2)
    assert out2.shape == (1, 3, H2, W2)
    assert jnp.allclose(out2, ref2, atol=1e-5), "mismatch vs reference (24x16)"

    print("KERNEL_OK")
</pallas_src>

<mosaic_0001>
module attributes {stable_mosaic.version = 11 : i64} {
  func.func @_spatial_transformer_kernel(%arg0: i32, %arg1: memref<48x16xbf16, #tpu.memory_space<vmem>>, %arg2: memref<48x16xbf16, #tpu.memory_space<vmem>>, %arg3: memref<2x128xf32, #tpu.memory_space<vmem>>, %arg4: memref<3x128xf32, #tpu.memory_space<vmem>>) attributes {dimension_semantics = [#tpu.dimension_semantics<parallel>], iteration_bounds = array<i64: 2>, scalar_prefetch = 0 : i64, scratch_operands = 0 : i64, tpu.core_type = #tpu.core_type<tc>, window_params = [{pipeline_mode = #tpu.pipeline_mode<synchronous>, transform_indices = @transform_0, window_bounds = array<i64: 48, 16>}, {pipeline_mode = #tpu.pipeline_mode<synchronous>, transform_indices = @transform_1, window_bounds = array<i64: 48, 16>}, {transform_indices = @transform_2, window_bounds = array<i64: 2, 128>}, {transform_indices = @transform_3, window_bounds = array<i64: 3, 128>}]} {
    %0 = tpu.iota {dimensions = array<i32: 1>} : vector<1x128xi32>
    %c128_i32 = arith.constant 128 : i32
    %1 = arith.muli %arg0, %c128_i32 : i32
    %2 = vector.broadcast %1 : i32 to vector<1x128xi32>
    %3 = arith.addi %0, %2 : vector<1x128xi32>
    %4 = arith.sitofp %3 : vector<1x128xi32> to vector<1x128xf32>
    %cst = arith.constant 1.600000e+01 : f32
    %5 = vector.broadcast %cst : f32 to vector<1x128xf32>
    %6 = arith.divf %4, %5 : vector<1x128xf32>
    %7 = math.floor %6 : vector<1x128xf32>
    %cst_0 = arith.constant 1.600000e+01 : f32
    %8 = vector.broadcast %cst_0 : f32 to vector<1x128xf32>
    %9 = arith.mulf %7, %8 : vector<1x128xf32>
    %10 = arith.subf %4, %9 : vector<1x128xf32>
    %c0 = arith.constant 0 : index
    %c0_1 = arith.constant 0 : index
    %11 = vector.load %arg3[%c0, %c0_1] : memref<2x128xf32, #tpu.memory_space<vmem>>, vector<1x128xf32>
    %12 = arith.addf %7, %11 : vector<1x128xf32>
    %c1 = arith.constant 1 : index
    %c0_2 = arith.constant 0 : index
    %13 = vector.load %arg3[%c1, %c0_2] : memref<2x128xf32, #tpu.memory_space<vmem>>, vector<1x128xf32>
    %14 = arith.addf %10, %13 : vector<1x128xf32>
    %cst_3 = arith.constant 1.500000e+01 : f32
    %15 = vector.broadcast %cst_3 : f32 to vector<1x128xf32>
    %16 = arith.divf %12, %15 : vector<1x128xf32>
    %cst_4 = arith.constant 5.000000e-01 : f32
    %17 = vector.broadcast %cst_4 : f32 to vector<1x128xf32>
    %18 = arith.subf %16, %17 : vector<1x128xf32>
    %cst_5 = arith.constant 2.000000e+00 : f32
    %19 = vector.broadcast %cst_5 : f32 to vector<1x128xf32>
    %20 = arith.mulf %19, %18 : vector<1x128xf32>
    %cst_6 = arith.constant 1.500000e+01 : f32
    %21 = vector.broadcast %cst_6 : f32 to vector<1x128xf32>
    %22 = arith.divf %14, %21 : vector<1x128xf32>
    %cst_7 = arith.constant 5.000000e-01 : f32
    %23 = vector.broadcast %cst_7 : f32 to vector<1x128xf32>
    %24 = arith.subf %22, %23 : vector<1x128xf32>
    %cst_8 = arith.constant 2.000000e+00 : f32
    %25 = vector.broadcast %cst_8 : f32 to vector<1x128xf32>
    %26 = arith.mulf %25, %24 : vector<1x128xf32>
    %cst_9 = arith.constant 1.000000e+00 : f32
    %27 = vector.broadcast %cst_9 : f32 to vector<1x128xf32>
    %28 = arith.addf %20, %27 : vector<1x128xf32>
    %cst_10 = arith.constant 1.600000e+01 : f32
    %29 = vector.broadcast %cst_10 : f32 to vector<1x128xf32>
    %30 = arith.mulf %28, %29 : vector<1x128xf32>
    %cst_11 = arith.constant 1.000000e+00 : f32
    %31 = vector.broadcast %cst_11 : f32 to vector<1x128xf32>
    %32 = arith.subf %30, %31 : vector<1x128xf32>
    %cst_12 = arith.constant 5.000000e-01 : f32
    %33 = vector.broadcast %cst_12 : f32 to vector<1x128xf32>
    %34 = arith.mulf %32, %33 : vector<1x128xf32>
    %cst_13 = arith.constant 1.000000e+00 : f32
    %35 = vector.broadcast %cst_13 : f32 to vector<1x128xf32>
    %36 = arith.addf %26, %35 : vector<1x128xf32>
    %cst_14 = arith.constant 1.600000e+01 : f32
    %37 = vector.broadcast %cst_14 : f32 to vector<1x128xf32>
    %38 = arith.mulf %36, %37 : vector<1x128xf32>
    %cst_15 = arith.constant 1.000000e+00 : f32
    %39 = vector.broadcast %cst_15 : f32 to vector<1x128xf32>
    %40 = arith.subf %38, %39 : vector<1x128xf32>
    %cst_16 = arith.constant 5.000000e-01 : f32
    %41 = vector.broadcast %cst_16 : f32 to vector<1x128xf32>
    %42 = arith.mulf %40, %41 : vector<1x128xf32>
    %43 = math.roundeven %34 : vector<1x128xf32>
    %44 = math.roundeven %42 : vector<1x128xf32>
    %cst_17 = arith.constant 0.000000e+00 : f32
    %45 = vector.broadcast %cst_17 : f32 to vector<1x128xf32>
    %46 = arith.cmpf oge, %44, %45 : vector<1x128xf32>
    %cst_18 = arith.constant 1.600000e+01 : f32
    %cst_19 = arith.constant 1.000000e+00 : f32
    %47 = arith.subf %cst_18, %cst_19 : f32
    %48 = vector.broadcast %47 : f32 to vector<1x128xf32>
    %49 = arith.cmpf ole, %44, %48 : vector<1x128xf32>
    %50 = arith.andi %46, %49 : vector<1x128xi1>
    %cst_20 = arith.constant 0.000000e+00 : f32
    %51 = vector.broadcast %cst_20 : f32 to vector<1x128xf32>
    %52 = arith.cmpf oge, %43, %51 : vector<1x128xf32>
    %53 = arith.andi %50, %52 : vector<1x128xi1>
    %cst_21 = arith.constant 1.600000e+01 : f32
    %cst_22 = arith.constant 1.000000e+00 : f32
    %54 = arith.subf %cst_21, %cst_22 : f32
    %55 = vector.broadcast %54 : f32 to vector<1x128xf32>
    %56 = arith.cmpf ole, %43, %55 : vector<1x128xf32>
    %57 = arith.andi %53, %56 : vector<1x128xi1>
    %cst_23 = arith.constant 1.600000e+01 : f32
    %cst_24 = arith.constant 1.000000e+00 : f32
    %58 = arith.subf %cst_23, %cst_24 : f32
    %cst_25 = arith.constant 0.000000e+00 : f32
    %59 = vector.broadcast %cst_25 : f32 to vector<1x128xf32>
    %60 = arith.maximumf %59, %43 : vector<1x128xf32>
    %61 = vector.broadcast %58 : f32 to vector<1x128xf32>
    %62 = arith.minimumf %61, %60 : vector<1x128xf32>
    %63 = arith.fptosi %62 : vector<1x128xf32> to vector<1x128xi32>
    %cst_26 = arith.constant 1.600000e+01 : f32
    %cst_27 = arith.constant 1.000000e+00 : f32
    %64 = arith.subf %cst_26, %cst_27 : f32
    %cst_28 = arith.constant 0.000000e+00 : f32
    %65 = vector.broadcast %cst_28 : f32 to vector<1x128xf32>
    %66 = arith.maximumf %65, %44 : vector<1x128xf32>
    %67 = vector.broadcast %64 : f32 to vector<1x128xf32>
    %68 = arith.minimumf %67, %66 : vector<1x128xf32>
    %69 = arith.fptosi %68 : vector<1x128xf32> to vector<1x128xi32>
    %c-1_i32 = arith.constant -1 : i32
    %70 = vector.broadcast %c-1_i32 : i32 to vector<1x128xi32>
    %71 = arith.select %57, %69, %70 : vector<1x128xi1>, vector<1x128xi32>
    %72 = tpu.iota {dimensions = array<i32: 0>} : vector<16x128xi32>
    %73 = vector.broadcast %71 : vector<1x128xi32> to vector<16x128xi32>
    %74 = arith.cmpi eq, %72, %73 : vector<16x128xi32>
    %75 = arith.extui %74 : vector<16x128xi1> to vector<16x128xi32>
    %76 = arith.sitofp %75 : vector<16x128xi32> to vector<16x128xf32>
    %77 = arith.truncf %76 : vector<16x128xf32> to vector<16x128xbf16>
    %c0_29 = arith.constant 0 : index
    %c0_30 = arith.constant 0 : index
    %78 = vector.load %arg1[%c0_29, %c0_30] : memref<48x16xbf16, #tpu.memory_space<vmem>>, vector<48x16xbf16>
    %cst_31 = arith.constant dense<0.000000e+00> : vector<48x128xf32>
    %79 = tpu.matmul %78, %77, %cst_31 {dimension_numbers = #tpu.dot_dimension_numbers<[1], [0], [0], [1], [0, 0, 1, 1], [], []>} : vector<48x16xbf16>, vector<16x128xbf16>, vector<48x128xf32> -> vector<48x128xf32>
    %c0_32 = arith.constant 0 : index
    %c0_33 = arith.constant 0 : index
    %80 = vector.load %arg2[%c0_32, %c0_33] : memref<48x16xbf16, #tpu.memory_space<vmem>>, vector<48x16xbf16>
    %cst_34 = arith.constant dense<0.000000e+00> : vector<48x128xf32>
    %81 = tpu.matmul %80, %77, %cst_34 {dimension_numbers = #tpu.dot_dimension_numbers<[1], [0], [0], [1], [0, 0, 1, 1], [], []>} : vector<48x16xbf16>, vector<16x128xbf16>, vector<48x128xf32> -> vector<48x128xf32>
    %82 = arith.addf %79, %81 : vector<48x128xf32>
    %83 = tpu.iota {dimensions = array<i32: 0>} : vector<16x128xi32>
    %84 = vector.broadcast %63 : vector<1x128xi32> to vector<16x128xi32>
    %85 = arith.cmpi eq, %83, %84 : vector<16x128xi32>
    %86 = vector.extract_strided_slice %82 {offsets = [0, 0], sizes = [16, 128], strides = [1, 1]} : vector<48x128xf32> to vector<16x128xf32>
    %cst_35 = arith.constant 0.000000e+00 : f32
    %87 = vector.broadcast %cst_35 : f32 to vector<16x128xf32>
    %88 = arith.select %85, %86, %87 : vector<16x128xi1>, vector<16x128xf32>
    %cst_36 = arith.constant dense<0.000000e+00> : vector<128xf32>
    %89 = vector.multi_reduction <add>, %88, %cst_36 [0] : vector<16x128xf32> to vector<128xf32>
    %90 = vector.shape_cast %89 : vector<128xf32> to vector<1x128xf32>
    %c0_37 = arith.constant 0 : index
    %c0_38 = arith.constant 0 : index
    %91 = vector.load %arg4[%c0_37, %c0_38] : memref<3x128xf32, #tpu.memory_space<vmem>>, vector<1x128xf32>
    tpu.vector_store %arg4[%c0_37, %c0_38], %90 {strides = array<i32>} : memref<3x128xf32, #tpu.memory_space<vmem>>, vector<1x128xf32>,
    %92 = vector.extract_strided_slice %82 {offsets = [16, 0], sizes = [16, 128], strides = [1, 1]} : vector<48x128xf32> to vector<16x128xf32>
    %cst_39 = arith.constant 0.000000e+00 : f32
    %93 = vector.broadcast %cst_39 : f32 to vector<16x128xf32>
    %94 = arith.select %85, %92, %93 : vector<16x128xi1>, vector<16x128xf32>
    %cst_40 = arith.constant dense<0.000000e+00> : vector<128xf32>
    %95 = vector.multi_reduction <add>, %94, %cst_40 [0] : vector<16x128xf32> to vector<128xf32>
    %96 = vector.shape_cast %95 : vector<128xf32> to vector<1x128xf32>
    %c1_41 = arith.constant 1 : index
    %c0_42 = arith.constant 0 : index
    %97 = vector.load %arg4[%c1_41, %c0_42] : memref<3x128xf32, #tpu.memory_space<vmem>>, vector<1x128xf32>
    tpu.vector_store %arg4[%c1_41, %c0_42], %96 {strides = array<i32>} : memref<3x128xf32, #tpu.memory_space<vmem>>, vector<1x128xf32>,
    %98 = vector.extract_strided_slice %82 {offsets = [32, 0], sizes = [16, 128], strides = [1, 1]} : vector<48x128xf32> to vector<16x128xf32>
    %cst_43 = arith.constant 0.000000e+00 : f32
    %99 = vector.broadcast %cst_43 : f32 to vector<16x128xf32>
    %100 = arith.select %85, %98, %99 : vector<16x128xi1>, vector<16x128xf32>
    %cst_44 = arith.constant dense<0.000000e+00> : vector<128xf32>
    %101 = vector.multi_reduction <add>, %100, %cst_44 [0] : vector<16x128xf32> to vector<128xf32>
    %102 = vector.shape_cast %101 : vector<128xf32> to vector<1x128xf32>
    %c2 = arith.constant 2 : index
    %c0_45 = arith.constant 0 : index
    %103 = vector.load %arg4[%c2, %c0_45] : memref<3x128xf32, #tpu.memory_space<vmem>>, vector<1x128xf32>
    tpu.vector_store %arg4[%c2, %c0_45], %102 {strides = array<i32>} : memref<3x128xf32, #tpu.memory_space<vmem>>, vector<1x128xf32>,
    return
  }
  func.func @transform_0(%arg0: i32) -> (i32, i32) {
    %c0_i32 = arith.constant 0 : i32
    %c0_i32_0 = arith.constant 0 : i32
    %c0_i32_1 = arith.constant 0 : i32
    return %c0_i32, %c0_i32_0 : i32, i32
  }
  func.func @transform_1(%arg0: i32) -> (i32, i32) {
    %c0_i32 = arith.constant 0 : i32
    %c0_i32_0 = arith.constant 0 : i32
    %c0_i32_1 = arith.constant 0 : i32
    return %c0_i32, %c0_i32_0 : i32, i32
  }
  func.func @transform_2(%arg0: i32) -> (i32, i32) {
    %c0_i32 = arith.constant 0 : i32
    %c0_i32_0 = arith.constant 0 : i32
    return %c0_i32, %arg0 : i32, i32
  }
  func.func @transform_3(%arg0: i32) -> (i32, i32) {
    %c0_i32 = arith.constant 0 : i32
    %c0_i32_0 = arith.constant 0 : i32
    return %c0_i32, %arg0 : i32, i32
  }
}

</mosaic_0001>

<bundles_post_ra>
// kernel: tpu_custom_call.1
= control target key start
LH: loop header
LB: loop body
LE: loop exit
PB: predicated region body
PF: predicated region fallthrough
CT: control target
= control target key end

     0   :  { %8 = vsyncpa [#allocation3], 0  ;;  %s804_s0 = inlined_call_operand.vmem [shape: bf16[48,16], index: 0, kind: input, shape index: {}]   ;;  %s805_s1 = inlined_call_operand.vmem [shape: bf16[48,16], index: 1, kind: input, shape index: {}]   ;;  %s806_s2 = inlined_call_operand.vmem [shape: f32[2,256], index: 2, kind: input, shape index: {}]   ;;  %s807_s3 = inlined_call_operand.hbm [shape: f32[3,256], index: 3, kind: output, shape index: {}]  }
   0x1   :  { %10 = vsyncpa [#allocation3 + $0x1], 0  ;;  %s673_s12 = smov 0   ;;  %s675_s13 = smov 0  }
   0x2   :  { %s677_s14 = smov 0   ;;  %s679_s15 = smov 0  }
   0x3 LB: > { %s694_s16 = sadd.s32 4294967295, %s648_s15   ;;  %s453_s17 = sadd.s32 4294967294, %s648_s15   ;;  %s648_s15 = sphi %s679_s15, %s813_s15   ;;  %s644_s14 = sphi %s677_s14, %s812_s14   ;;  %s640_s13 = sphi %s675_s13, %s811_s13   ;;  %s636_s12 = sphi %s673_s12, %s810_s12  }
   0x4   : > { %s698_s18 = sadd.s32 1, %s648_s15   ;;  %s91_s19 = sadd.s32 1, %s644_s14 }
   0x5   : > { %s88_s20 = ssub.s32 %s648_s15, %s698_s18  ;;  %p101_p0 = scmp.ne.s32.totalorder %s644_s14, %s640_s13 }
   0x6   : > { %p89_p1 = scmp.eq.s32.totalorder %s88_s20, 0  ;;  %p102_p2 = scmp.eq.s32.totalorder %s694_s16, 1 }
   0x7   : > { %p107_p3 = scmp.ne.s32.totalorder %s640_s13, %s636_s12  ;;  %p108_p4 = scmp.eq.s32.totalorder %s453_s17, 1 }
   0x8   : > { %s709_s21 = scalar_select %p89_p1, %s644_s14, %s91_s19  }
   0x9   : > { %p711_p5 = por %p102_p2, %p101_p0  ;;  %p715_p6 = por %p108_p4, %p107_p3 }
   0xa   : > { %p456_p7 = scmp.ge.s32.totalorder %s648_s15, 1  ;;  %p139_p8 = scmp.lt.s32.totalorder %s648_s15, 3 }
   0xc   : > { %p140_p9 = pnand %p456_p7, %p139_p8 }
   0xd   : > { %s459_s24 = sshll.u32 (!%p140_p9), %s694_s16, 7  ;;  %p162_p10 = scmp.lt.s32.totalorder (!%p140_p9), %s694_s16, 1 }
   0xe   : > { %143 = sbr.rel (%p140_p9) target bundleno = 257 (0x101), region = 32  ;;  %s507_s27 = sshll.u32 (!%p140_p9), %s694_s16, 2 }
   0xf   : > { %s389_s30 = scalar_lea.hbm (!%p140_p9), %s807_s3, %s507_s27  ;;  %s606_s10 = scalar_lea.hbm (!%p140_p9), %s807_s3, 8 }
  0x10   : > { %s393_s5 = sshll.u32 (!%p140_p9), %s389_s30, 4  ;;  %s394_s5 = int_to_ptr.hbm [resolvable:$true] %s393_s5 }
  0x11   : > { %s600_s7 = sshra.s32 (!%p140_p9), %s394_s5, 4  ;;  %s601_s7 = int_to_ptr.hbm [resolvable:$true] %s600_s7 }
  0x12   : > { %p607_p0 = scmp.lt.s32.totalorder (!%p140_p9), %s601_s7, %s807_s3 }
  0x13   : > { %v167_v0 = vlaneseq  ;;  %v650_v1 = vmov 16.0   ;;  %v651_v2 = vmov 15.0   ;;  %v170_v4 = vstv %s459_s24  ;;  %s163_s25 = scalar_select %p162_p10, %s694_s16, 1  ;;  %v514_v62 = vld [vmem:[%s805_s1 + $0x8] sm:$0xff] }
  0x14   : > { %582 = vrcp.f32 %v650_v1  ;;  %v511_v63 = vld [vmem:[%s804_s0 + $0x8] sm:$0xff]  ;;  %vm263_vm14 = vcmask 130048   ;;  %v513_v1 = vld [vmem:[%s805_s1] sm:$0xff]  ;;  %s159_s24 = sand.u32 1, %s640_s13   ;;  %s602_s16 = scalar_lea.hbm %s601_s7, 4 }
  0x15   : > { %584 = vrcp.f32 %v651_v2  ;;  %v168_v3 = vand.u32 127, %v167_v0  ;;  %s458_s26 = sshll.u32 %s163_s25, 1  ;;  %v729_v57 = vshrl.u32 %v167_v0, 7  ;;  %v652_v0 = vmov 1.0|1.0   ;;  %v510_v2 = vld [vmem:[%s804_s0] sm:$0xff]  ;;  %p603_p11 = scmp.ne.s32.totalorder %s601_s7, %s602_s16 }
  0x16   : > { %s165_s29 = scalar_lea.vmem %s806_s2, %s458_s26  ;;  %s457_s25 = sshll.u32 %s159_s24, 2 }
  0x17   : > { %v171_v8 = vadd.s32 %v170_v4, %v168_v3  ;;  %v184_v19 = vld [vmem:[%s165_s29] sm:$0x1]  ;;  %v186_v24 = vld [vmem:[%s165_s29 + $0x1] sm:$0x1]  ;;  %v732_v59 = vadd.s32 8, %v729_v57  ;;  %v515_v3 = vld [vmem:[%s805_s1 + $0x10] sm:$0xff]  ;;  %p604_p12 = pnand %p603_p11, %p711_p5  ;;  %p608_p1 = scmp.lt.s32.totalorder %s606_s10, %s602_s16 }
  0x18   : > { %v512_v4 = vld [vmem:[%s804_s0 + $0x10] sm:$0xff]  ;;  %s161_s26 = scalar_lea.vmem [#allocation2], %s457_s25  ;;  %s379_s6 = scalar_lea.sflag [#allocation3], %s159_s24 }
  0x19   : > { %v172_v13 = vcvt.s32.f32 %v171_v8  ;;  %s391_s4 = sshll.u32 %s161_s26, 4  ;;  %p605_p13 = pneg %p604_p12  ;;  %s392_s4 = int_to_ptr.vmem [resolvable:$true] %s391_s4 }
  0x1a   : > { %v583_v5 = vpop.eup %582  ;;  %p609_p2 = por %p608_p1, %p607_p0 }
  0x1b   : > { %v585_v6 = vpop.eup %584  ;;  %v174_v7 = vmul.f32 16.0, %v583_v5  ;;  %vm178_vm0 = vweird.f32 %v583_v5 }
  0x1c   : > { %v189_v9 = vmul.f32 15.0, %v585_v6  ;;  %vm193_vm1 = vweird.f32 %v585_v6  ;;  %p610_p3 = pnand %p609_p2, %p605_p13 }
  0x1d   : > { %v175_v10 = vsub.f32 1.0, %v174_v7 }
  0x1e   : > { %v190_v11 = vsub.f32 1.0, %v189_v9 }
  0x1f   : > { %v176_v12 = vmul.f32 %v583_v5, %v175_v10 }
  0x20   : > { %v191_v14 = vmul.f32 %v585_v6, %v190_v11 }
  0x21   : > { %v177_v15 = vadd.f32 %v583_v5, %v176_v12 }
  0x22   : > { %v192_v17 = vadd.f32 %v585_v6, %v191_v14 }
  0x23   : > { %v179_v16 = vsel %vm178_vm0, %v583_v5, %v177_v15 }
  0x24   : > { %v180_v18 = vmul.f32 %v179_v16, %v172_v13  ;;  %v194_v21 = vsel %vm193_vm1, %v585_v6, %v192_v17 }
  0x26   : > { %v181_v20 = vfloor.f32 %v180_v18 }
  0x28   : > { %v182_v22 = vmul.f32 16.0, %v181_v20  ;;  %v185_v23 = vadd.f32 %v184_v19, %v181_v20 }
  0x2a   : > { %v183_v25 = vsub.f32 %v172_v13, %v182_v22  ;;  %v195_v26 = vmul.f32 %v194_v21, %v185_v23 }
  0x2c   : > { %v187_v27 = vadd.f32 %v186_v24, %v183_v25  ;;  %v460_v28 = vadd.f32 -0.5, %v195_v26 }
  0x2e   : > { %v197_v29 = vmul.f32 2.0, %v460_v28  ;;  %v198_v30 = vmul.f32 %v194_v21, %v187_v27 }
  0x30   : > { %v461_v31 = vadd.f32 -0.5, %v198_v30  ;;  %v201_v32 = vadd.f32 1.0, %v197_v29 }
  0x32   : > { %v200_v33 = vmul.f32 2.0, %v461_v31  ;;  %v202_v34 = vmul.f32 16.0, %v201_v32 }
  0x34   : > { %v462_v35 = vadd.f32 -1.0, %v202_v34  ;;  %v205_v36 = vadd.f32 1.0, %v200_v33 }
  0x36   : > { %v204_v37 = vmul.f32 0.5, %v462_v35  ;;  %v206_v38 = vmul.f32 16.0, %v205_v36 }
  0x38   : > { %v463_v39 = vadd.f32 -1.0, %v206_v38  ;;  %v520_v40 = vcvt.f32.s32 %v204_v37  ;;  %v518_v42 = vand.u32 2147483647, %v204_v37  ;;  %v523_v44 = vand.u32 2147483648, %v204_v37 }
  0x39   : > { %v464_v5 = vmax.f32 %v204_v37, 0.0 }
  0x3a   : > { %v208_v41 = vmul.f32 0.5, %v463_v39  ;;  %v521_v43 = vcvt.s32.f32 %v520_v40  ;;  %vm519_vm2 = vcmp.lt.f32.partialorder %v518_v42, 8388608.0 }
  0x3b   : > { %v465_v6 = vmin.f32 %v464_v5, 15.0 }
  0x3c   : > { %v522_v45 = vand.u32 2147483647, %v521_v43  ;;  %v528_v46 = vcvt.f32.s32 %v208_v41  ;;  %v526_v47 = vand.u32 2147483647, %v208_v41  ;;  %v467_v48 = vmax.f32 %v208_v41, 0.0 }
  0x3d   : > { %v531_v51 = vand.u32 2147483648, %v208_v41  ;;  %v536_v7 = vcvt.f32.s32 %v465_v6 }
  0x3e   : > { %v524_v49 = vor.u32 %v523_v44, %v522_v45  ;;  %v529_v50 = vcvt.s32.f32 %v528_v46  ;;  %vm527_vm3 = vcmp.lt.f32.partialorder %v526_v47, 8388608.0  ;;  %v468_v54 = vmin.f32 %v467_v48, 15.0 }
  0x3f   : > { %v345_v10 = vperm.slane %v536_v7, 0 }
  0x40   : > { %v530_v52 = vand.u32 2147483647, %v529_v50  ;;  %v525_v53 = vsel %vm519_vm2, %v524_v49, %v204_v37  ;;  %v539_v58 = vcvt.f32.s32 %v468_v54 }
  0x41   : > { %vm214_vm4 = vcmp.ge.f32.partialorder %v525_v53, 0.0  ;;  %vm216_vm7 = vcmp.le.f32.partialorder %v525_v53, 15.0  ;;  %vm346_vm15 = vcmp.eq.s32.totalorder %v729_v57, %v345_v10  ;;  %vm347_vm0 = vcmp.eq.s32.totalorder %v732_v59, %v345_v10 }
  0x42   : > { %v532_v55 = vor.u32 %v531_v51, %v530_v52 }
  0x44   : > { %v533_v56 = vsel %vm527_vm3, %v532_v55, %v208_v41 }
  0x45   : > { %vm211_vm5 = vcmp.ge.f32.partialorder %v533_v56, 0.0  ;;  %vm212_vm6 = vcmp.le.f32.partialorder %v533_v56, 15.0 }
  0x46   : > { %vm213_vm8 = vmand %vm211_vm5, %vm212_vm6 }
  0x47   : > { %vm215_vm9 = vmand %vm213_vm8, %vm214_vm4 }
  0x48   : > { %vm217_vm10 = vmand %vm215_vm9, %vm216_vm7 }
  0x49   : > { %v224_v60 = vsel %vm217_vm10, %v539_v58, 4294967295 }
  0x4a   : > { %v228_v61 = vperm.slane %v224_v60, 0 }
  0x4c   : > { %vm229_vm11 = vcmp.eq.s32.totalorder %v729_v57, %v228_v61  ;;  %vm230_vm12 = vcmp.eq.s32.totalorder %v732_v59, %v228_v61 }
  0x4d   : > { %vm484_vm13 = vmpackc.low %vm230_vm12, %vm229_vm11 }
  0x4e   : > { %516 = vmatpush.bf16.msk.msra.mxu2 %vm484_vm13, %v652_v0  ;;  %517 = vmatpush.bf16.msk.msra.mxu3 %vm484_vm13, %v652_v0 }
  0x4f   : > { %485 = vmatpush.bf16.msk.msra.mxu0 %vm484_vm13, %v652_v0  ;;  %502 = vmatpush.bf16.msk.msra.mxu1 %vm484_vm13, %v652_v0 }
  0x51   : > { %487 = vmatmul.msk.bf16.vlgmr.msra.gmra.mxu2 %vm263_vm14, %v514_v62  ;;  %504 = vmatmul.msk.bf16.vlgmr.msra.gmra.mxu3 %vm263_vm14, %v511_v63 }
  0x52   : > { %486 = vmatmul.msk.bf16.vlgmr.msra.gmra.mxu0 %vm263_vm14, %v513_v1  ;;  %503 = vmatmul.msk.bf16.vlgmr.msra.gmra.mxu1 %vm263_vm14, %v510_v2 }
  0x61   : > { %488 = vmatmul.msk.bf16.gmra.mxu2 %vm263_vm14, %v515_v3  ;;  %505 = vmatmul.msk.bf16.gmra.mxu3 %vm263_vm14, %v512_v4 }
  0xcf   : > { %v282_v8 = vpop.f32.mrf.mxu0  ;;  %v330_v9 = vpop.f32.mrf.mxu1 }
  0xd0   : > { %v331_v13 = vadd.f32 %v330_v9, %v282_v8 }
  0xd2   : > { %v348_v16 = vsel %vm346_vm15, %v331_v13, 0.0 }
  0xd4   : > { %v287_v11 = vpop.f32.mrf.mxu2  ;;  %v335_v12 = vpop.f32.mrf.mxu3 }
  0xd5   : > { %v336_v19 = vadd.f32 %v335_v12, %v287_v11 }
  0xd7   : > { %v284_v14 = vpop.f32.mrf.mxu0  ;;  %v332_v15 = vpop.f32.mrf.mxu1  ;;  %v358_v25 = vsel %vm346_vm15, %v336_v19, 0.0 }
  0xd8   : > { %v333_v17 = vadd.f32 %v332_v15, %v284_v14 }
  0xda   : > { %v349_v18 = vsel %vm347_vm0, %v333_v17, 0.0 }
  0xdb   : > { %v350_v20 = vadd.f32 %v349_v18, %v348_v16 }
  0xdc   : > { %v289_v21 = vpop.f32.mrf.mxu2  ;;  %v337_v22 = vpop.f32.mrf.mxu3 }
  0xdd   : > { %v338_v23 = vadd.f32 %v337_v22, %v289_v21  ;;  %v351_v24 = vrot.slane %v350_v20, 4 }
  0xdf   : > { %v359_v26 = vsel %vm347_vm0, %v338_v23, 0.0  ;;  %v352_v27 = vadd.f32 %v351_v24, %v350_v20 }
  0xe0   : > { %v360_v28 = vadd.f32 %v359_v26, %v358_v25 }
  0xe1   : > { %v353_v29 = vrot.slane %v352_v27, 2 }
  0xe2   : > { %v361_v30 = vrot.slane %v360_v28, 4 }
  0xe3   : > { %v354_v31 = vadd.f32 %v353_v29, %v352_v27 }
  0xe4   : > { %v362_v32 = vadd.f32 %v361_v30, %v360_v28  ;;  %v292_v33 = vpop.f32.mrf.mxu2  ;;  %v340_v34 = vpop.f32.mrf.mxu3 }
  0xe5   : > { %v355_v35 = vrot.slane %v354_v31, 1  ;;  %v341_v40 = vadd.f32 %v340_v34, %v292_v33 }
  0xe6   : > { %v363_v36 = vrot.slane %v362_v32, 2 }
  0xe7   : > { %v356_v37 = vadd.f32 %v355_v35, %v354_v31  ;;  %v368_v45 = vsel %vm346_vm15, %v341_v40, 0.0 }
  0xe8   : > { %v364_v38 = vadd.f32 %v363_v36, %v362_v32 }
  0xe9   : > { %357 = vst [vmem:[%s161_s26] sm:$0x1] %v356_v37 }
  0xea   : > { %v365_v39 = vrot.slane %v364_v38, 1 }
  0xec   : > { %v366_v41 = vadd.f32 %v365_v39, %v364_v38  ;;  %v294_v42 = vpop.f32.mrf.mxu2  ;;  %v342_v43 = vpop.f32.mrf.mxu3 }
  0xed   : > { %v343_v44 = vadd.f32 %v342_v43, %v294_v42 }
  0xee   : > { %367 = vst [vmem:[%s161_s26 + $0x1] sm:$0x1] %v366_v41 }
  0xef   : > { %v369_v46 = vsel %vm347_vm0, %v343_v44, 0.0 }
  0xf0   : > { %v370_v47 = vadd.f32 %v369_v46, %v368_v45 }
  0xf2   : > { %v371_v48 = vrot.slane %v370_v47, 4 }
  0xf4   : > { %v372_v49 = vadd.f32 %v371_v48, %v370_v47 }
  0xf6   : > { %v373_v50 = vrot.slane %v372_v49, 2 }
  0xf8   : > { %v374_v51 = vadd.f32 %v373_v50, %v372_v49 }
  0xfa   : > { %v375_v52 = vrot.slane %v374_v51, 1 }
  0xfc   : > { %v376_v53 = vadd.f32 %v375_v52, %v374_v51 }
  0xfe   : > { %377 = vst [vmem:[%s161_s26 + $0x2] sm:$0x1] %v376_v53 }
  0xff   : > { %613 = shalt.err (!%p610_p3)
}
 0x100   : > { %540 = dma.vmem_to_hbm [thread:$0]  (%p711_p5), %s392_s4, 64, %s394_s5, %s379_s6  }
 0x101 PF: > { %p546_p4 = scmp.ge.s32.totalorder %s648_s15, 2  ;;  %s405_s19 = sand.u32 1, %s636_s12  }
 0x102   : > { %s406_s20 = scalar_lea.sflag [#allocation3], %s405_s19 }
 0x103   : > { %p543_p7 = pnand %p546_p4, %p715_p6 }
 0x105   : > { %p544_p8 = pneg %p543_p7 }
 0x107   : > { %631 = dma.done.wait (%p544_p8), %s406_s20, 64  }
 0x108   : > { %633 = vsyncadd (%p544_p8), %s406_s20, 4294967232  ;;  %p13_p9 = scmp.ge.s32.totalorder %s698_s18, 4   ;;  %s810_s12 = smov %s640_s13 }
 0x109   : > { %s811_s13 = smov %s644_s14  ;;  %s812_s14 = smov %s709_s21 }
 0x10a   : > { %s813_s15 = smov %s698_s18  ;;  %15 = sbr.rel (!%p13_p9) target bundleno = 3 (0x3), region = 67 }
 0x10f   :  { %412 = vsyncpa [#allocation3], 1 }
 0x110   :  { %414 = vsyncpa [#allocation3 + $0x1], 1 }

</bundles_post_ra>
